<compile_context>
chip_gen: v7x
topology: tpu7x:2x2x1
jax: 0.10.0
libtpu: 0.0.40
codegen_flags: <defaults>
</compile_context>

<pallas_src>
import functools

import jax
import jax.numpy as jnp
from jax import lax
from jax.experimental import pallas as pl
from jax.experimental.pallas import tpu as pltpu


# ---------------------------------------------------------------------------
# Kernels
# ---------------------------------------------------------------------------

def _qkv_kernel(x_ref, wqkv_ref, qkv_ref, *, scale, embed_dim):
    # blocks: x (1, N, E) f32; wqkv (3E, E) bf16 (torch layout: out_feat, in_feat)
    x = x_ref[0].astype(jnp.bfloat16)                     # (N, E) bf16 MXU operand
    # x @ W_qkv.T without materializing a transpose: contract last dims.
    qkv = lax.dot_general(x, wqkv_ref[...], (((1,), (1,)), ((), ())),
                          preferred_element_type=jnp.float32)      # (N, 3E) f32
    # Fold 1/sqrt(Dh) into the q lanes only (first E columns) — N*E VALU ops,
    # so the (H, N, N) score tiles in call B never get scaled.
    col = lax.broadcasted_iota(jnp.int32, qkv.shape, 1)
    qkv = jnp.where(col < embed_dim, qkv * scale, qkv)
    qkv_ref[0] = qkv.astype(qkv_ref.dtype)                # bf16 lane-dense store


def _attn_out_kernel(q_ref, k_ref, v_ref, wo_ref, bo_ref, o_ref):
    # blocks: q/k/v (1, H, N, Dh) bf16 (q pre-scaled); wo (H, E, Dh) bf16;
    #         bo (1, E) f32; out (1, N, E) f32
    nb_head = q_ref.shape[1]
    n = q_ref.shape[2]
    e_out = wo_ref.shape[1]

    q3 = q_ref[0]                                         # (H, N, Dh) bf16
    k3 = k_ref[0]
    v3 = v_ref[0]

    # scores for all heads at once: (H, N, N), f32 accumulation on the MXU
    s = lax.dot_general(q3, k3, (((2,), (2,)), ((0,), (0,))),
                        preferred_element_type=jnp.float32)
    # numerically-stable softmax, all math in f32 (v5e has no bf16 VPU/EUP)
    s = s - jnp.max(s, axis=-1, keepdims=True)
    p = jnp.exp(s)
    inv = pl.reciprocal(jnp.sum(p, axis=-1, keepdims=True), approx=False)  # EUP
    attn = (p * inv).astype(jnp.bfloat16)                 # bf16 MXU operand

    # attention output per head: (H, N, Dh), f32 accumulation
    o3 = lax.dot_general(attn, v3, (((2,), (1,)), ((0,), (0,))),
                         preferred_element_type=jnp.float32)
    o3 = o3.astype(jnp.bfloat16)

    # Head merge + output projection fused as H per-head MXU contractions:
    #   out[n, e] = sum_h sum_d o3[h, n, d] * wo_r[h, e, d]
    # == (out.transpose(1,2).reshape(N,E)) @ W_o.T — no scratch, no masked
    # sub-lane strip stores, accumulation stays in vregs.
    wo3 = wo_ref[...]                                     # (H, E, Dh) bf16
    acc = jnp.zeros((n, e_out), jnp.float32)
    for h in range(nb_head):                              # static, unrolled
        acc = acc + lax.dot_general(o3[h], wo3[h], (((1,), (1,)), ((), ())),
                                    preferred_element_type=jnp.float32)

    # Linear bias + Dropout(eval) == identity; single lane-dense f32 store.
    o_ref[0] = acc + bo_ref[...]


# ---------------------------------------------------------------------------
# Wrapper
# ---------------------------------------------------------------------------

def multihead_self_attention(x, wq, wk, wv, wo, bo, nb_head):
    b, n, e = x.shape
    dh = e // nb_head
    scale = 1.0 / (dh ** 0.5)

    # One stacked bf16 projection weight: one DMA stream, one MXU pass, one
    # lane-dense (B, N, 3E) output instead of three.
    wqkv = jnp.concatenate([wq, wk, wv], axis=0).astype(jnp.bfloat16)   # (3E, E)

    qkv_cost = pl.CostEstimate(
        flops=2 * b * n * e * (3 * e),
        transcendentals=0,
        bytes_accessed=b * n * e * 4 + 3 * e * e * 2 + b * n * 3 * e * 2,
    )

    # --- call A: fused Q/K/V projection (one grid step per batch) -----------
    qkv = pl.pallas_call(
        functools.partial(_qkv_kernel, scale=scale, embed_dim=e),
        grid=(b,),
        in_specs=[
            pl.BlockSpec((1, n, e), lambda i: (i, 0, 0)),
            pl.BlockSpec((3 * e, e), lambda i: (0, 0)),
        ],
        out_specs=pl.BlockSpec((1, n, 3 * e), lambda i: (i, 0, 0)),
        out_shape=jax.ShapeDtypeStruct((b, n, 3 * e), jnp.bfloat16),
        compiler_params=pltpu.CompilerParams(dimension_semantics=("parallel",)),
        cost_estimate=qkv_cost,
    )(x, wqkv)

    # torch's q.view(B, H, N, Dh): flat reinterpretation of the (B, N, E)
    # projection (NOT the usual split+transpose).  Kept at the XLA level; the
    # slices out of the fused (B, N, 3E) slab are free.
    q = qkv[:, :, :e].reshape(b, nb_head, n, dh)
    k = qkv[:, :, e:2 * e].reshape(b, nb_head, n, dh)
    v = qkv[:, :, 2 * e:].reshape(b, nb_head, n, dh)

    # W_o rearranged so the head merge becomes per-head contractions:
    # wo_r[h, e_out, d] == wo[e_out, h*dh + d]
    wo_r = wo.reshape(e, nb_head, dh).transpose(1, 0, 2).astype(jnp.bfloat16)
    bo2 = bo.reshape(1, e)

    attn_cost = pl.CostEstimate(
        flops=b * (2 * nb_head * n * n * dh    # q @ k.T
                   + 2 * nb_head * n * n * dh  # attn @ v
                   + 2 * n * e * e),           # output projection
        transcendentals=b * nb_head * n * n,   # exp
        bytes_accessed=3 * b * n * e * 2 + e * e * 2 + e * 4 + b * n * e * 4,
    )

    # --- call B: all-heads attention + fused merge + output projection ------
    out = pl.pallas_call(
        _attn_out_kernel,
        grid=(b,),
        in_specs=[
            pl.BlockSpec((1, nb_head, n, dh), lambda i: (i, 0, 0, 0)),
            pl.BlockSpec((1, nb_head, n, dh), lambda i: (i, 0, 0, 0)),
            pl.BlockSpec((1, nb_head, n, dh), lambda i: (i, 0, 0, 0)),
            pl.BlockSpec((nb_head, e, dh), lambda i: (0, 0, 0)),
            pl.BlockSpec((1, e), lambda i: (0, 0)),
        ],
        out_specs=pl.BlockSpec((1, n, e), lambda i: (i, 0, 0)),
        out_shape=jax.ShapeDtypeStruct((b, n, e), jnp.float32),
        compiler_params=pltpu.CompilerParams(dimension_semantics=("parallel",)),
        cost_estimate=attn_cost,
    )(q, k, v, wo_r, bo2)
    return out


# ---------------------------------------------------------------------------
# Pure-JAX reference (mirrors the PyTorch forward exactly, f32 end-to-end)
# ---------------------------------------------------------------------------

def reference(x, wq, wk, wv, wo, bo, nb_head):
    b, n, e = x.shape
    dh = e // nb_head
    q = (x @ wq.T).reshape(b, nb_head, n, dh)
    k = (x @ wk.T).reshape(b, nb_head, n, dh)
    v = (x @ wv.T).reshape(b, nb_head, n, dh)
    dots = jnp.einsum('bhnd,bhmd->bhnm', q, k) / (dh ** 0.5)
    attn = jax.nn.softmax(dots, axis=-1)
    out = jnp.einsum('bhnm,bhmd->bhnd', attn, v)
    out = out.transpose(0, 2, 1, 3).reshape(b, n, e)
    return out @ wo.T + bo


# ---------------------------------------------------------------------------

if __name__ == "__main__":
    B, N, E, H = 2, 8, 32, 4          # batch, seq (patches), embed_dim, nb_head
    key = jax.random.PRNGKey(0)
    kx, kq, kk, kv, ko, kb = jax.random.split(key, 6)

    bound = 1.0 / (E ** 0.5)          # nn.Linear default init range
    x = jax.random.normal(kx, (B, N, E), jnp.float32)
    wq = jax.random.uniform(kq, (E, E), jnp.float32, -bound, bound)
    wk = jax.random.uniform(kk, (E, E), jnp.float32, -bound, bound)
    wv = jax.random.uniform(kv, (E, E), jnp.float32, -bound, bound)
    wo = jax.random.uniform(ko, (E, E), jnp.float32, -bound, bound)
    bo = jax.random.uniform(kb, (E,), jnp.float32, -bound, bound)

    out = multihead_self_attention(x, wq, wk, wv, wo, bo, H)
    out = jax.block_until_ready(out)

    ref = reference(x, wq, wk, wv, wo, bo, H)
    assert out.shape == (B, N, E)
    # Tolerance reflects bf16 MXU operands (weights/activations/probs rounded
    # to bf16, f32 accumulation + f32 softmax); reference is f32 end-to-end.
    assert jnp.allclose(out, ref, rtol=2e-2, atol=2e-2), "mismatch vs reference"

    print("KERNEL_OK")
</pallas_src>

<mosaic_0001>
module attributes {stable_mosaic.version = 11 : i64} {
  func.func @_qkv_kernel(%arg0: i32, %arg1: memref<1x8x32xf32, #tpu.memory_space<vmem>>, %arg2: memref<96x32xbf16, #tpu.memory_space<vmem>>, %arg3: memref<1x8x96xbf16, #tpu.memory_space<vmem>>) attributes {dimension_semantics = [#tpu.dimension_semantics<parallel>], iteration_bounds = array<i64: 2>, scalar_prefetch = 0 : i64, scratch_operands = 0 : i64, tpu.core_type = #tpu.core_type<tc>, window_params = [{transform_indices = @transform_0, window_bounds = array<i64: 1, 8, 32>}, {pipeline_mode = #tpu.pipeline_mode<synchronous>, transform_indices = @transform_1, window_bounds = array<i64: 96, 32>}, {transform_indices = @transform_2, window_bounds = array<i64: 1, 8, 96>}]} {
    %c0 = arith.constant 0 : index
    %c0_0 = arith.constant 0 : index
    %c0_1 = arith.constant 0 : index
    %0 = vector.load %arg1[%c0, %c0_0, %c0_1] : memref<1x8x32xf32, #tpu.memory_space<vmem>>, vector<1x8x32xf32>
    %1 = vector.shape_cast %0 : vector<1x8x32xf32> to vector<8x32xf32>
    %2 = arith.truncf %1 : vector<8x32xf32> to vector<8x32xbf16>
    %c0_2 = arith.constant 0 : index
    %c0_3 = arith.constant 0 : index
    %3 = vector.load %arg2[%c0_2, %c0_3] : memref<96x32xbf16, #tpu.memory_space<vmem>>, vector<96x32xbf16>
    %cst = arith.constant dense<0.000000e+00> : vector<8x96xf32>
    %4 = tpu.matmul %2, %3, %cst {dimension_numbers = #tpu.dot_dimension_numbers<[1], [1], [0], [0], [0, 0, 1, 0], [], []>} : vector<8x32xbf16>, vector<96x32xbf16>, vector<8x96xf32> -> vector<8x96xf32>
    %5 = tpu.iota {dimensions = array<i32: 1>} : vector<8x96xi32>
    %c32_i32 = arith.constant 32 : i32
    %6 = vector.broadcast %c32_i32 : i32 to vector<8x96xi32>
    %7 = arith.cmpi slt, %5, %6 : vector<8x96xi32>
    %cst_4 = arith.constant 0.353553385 : f32
    %8 = vector.broadcast %cst_4 : f32 to vector<8x96xf32>
    %9 = arith.mulf %4, %8 : vector<8x96xf32>
    %10 = arith.select %7, %9, %4 : vector<8x96xi1>, vector<8x96xf32>
    %11 = arith.truncf %10 : vector<8x96xf32> to vector<8x96xbf16>
    %c0_5 = arith.constant 0 : index
    %c0_6 = arith.constant 0 : index
    %c0_7 = arith.constant 0 : index
    %12 = vector.load %arg3[%c0_5, %c0_6, %c0_7] : memref<1x8x96xbf16, #tpu.memory_space<vmem>>, vector<1x8x96xbf16>
    %13 = vector.shape_cast %12 : vector<1x8x96xbf16> to vector<8x96xbf16>
    %14 = vector.shape_cast %11 : vector<8x96xbf16> to vector<1x8x96xbf16>
    tpu.vector_store %arg3[%c0_5, %c0_6, %c0_7], %14 {strides = array<i32>} : memref<1x8x96xbf16, #tpu.memory_space<vmem>>, vector<1x8x96xbf16>,
    return
  }
  func.func @transform_0(%arg0: i32) -> (i32, i32, i32) {
    %c0_i32 = arith.constant 0 : i32
    %c0_i32_0 = arith.constant 0 : i32
    %c0_i32_1 = arith.constant 0 : i32
    return %arg0, %c0_i32, %c0_i32_0 : i32, i32, i32
  }
  func.func @transform_1(%arg0: i32) -> (i32, i32) {
    %c0_i32 = arith.constant 0 : i32
    %c0_i32_0 = arith.constant 0 : i32
    %c0_i32_1 = arith.constant 0 : i32
    return %c0_i32, %c0_i32_0 : i32, i32
  }
  func.func @transform_2(%arg0: i32) -> (i32, i32, i32) {
    %c0_i32 = arith.constant 0 : i32
    %c0_i32_0 = arith.constant 0 : i32
    %c0_i32_1 = arith.constant 0 : i32
    return %arg0, %c0_i32, %c0_i32_0 : i32, i32, i32
  }
}

</mosaic_0001>

<bundles_post_ra>
// kernel: tpu_custom_call.1
= control target key start
LH: loop header
LB: loop body
LE: loop exit
PB: predicated region body
PF: predicated region fallthrough
CT: control target
= control target key end

     0   :  { %7 = vsyncpa [#allocation3], 0  ;;  %s621_s0 = inlined_call_operand.vmem [shape: f32[2,8,32], index: 0, kind: input, shape index: {}]   ;;  %s622_s1 = inlined_call_operand.vmem [shape: bf16[96,32], index: 1, kind: input, shape index: {}]   ;;  %s623_s2 = inlined_call_operand.hbm [shape: bf16[2,8,96], index: 2, kind: output, shape index: {}]  }
   0x1   :  { %9 = vsyncpa [#allocation3 + $0x1], 0  ;;  %s496_s9 = smov 0   ;;  %s498_s10 = smov 0  }
   0x2   :  { %s500_s11 = smov 0   ;;  %s502_s12 = smov 0  }
   0x3 LB: > { %s517_s13 = sadd.s32 4294967295, %s476_s12   ;;  %s327_s14 = sadd.s32 4294967294, %s476_s12   ;;  %s476_s12 = sphi %s502_s12, %s629_s12   ;;  %s472_s11 = sphi %s500_s11, %s628_s11   ;;  %s468_s10 = sphi %s498_s10, %s627_s10   ;;  %s464_s9 = sphi %s496_s9, %s626_s9  }
   0x4   : > { %s521_s15 = sadd.s32 1, %s476_s12   ;;  %s69_s16 = sadd.s32 1, %s472_s11 }
   0x5   : > { %s66_s17 = ssub.s32 %s476_s12, %s521_s15  ;;  %p79_p0 = scmp.ne.s32.totalorder %s472_s11, %s468_s10 }
   0x6   : > { %p67_p1 = scmp.eq.s32.totalorder %s66_s17, 0  ;;  %p80_p2 = scmp.eq.s32.totalorder %s517_s13, 1 }
   0x7   : > { %p85_p3 = scmp.ne.s32.totalorder %s468_s10, %s464_s9  ;;  %p86_p4 = scmp.eq.s32.totalorder %s327_s14, 1 }
   0x8   : > { %s532_s18 = scalar_select %p67_p1, %s472_s11, %s69_s16  }
   0x9   : > { %p534_p5 = por %p80_p2, %p79_p0  ;;  %p538_p6 = por %p86_p4, %p85_p3 }
   0xa   : > { %p330_p7 = scmp.ge.s32.totalorder %s476_s12, 1  ;;  %p114_p8 = scmp.lt.s32.totalorder %s476_s12, 3 }
   0xc   : > { %p115_p9 = pnand %p330_p7, %p114_p8 }
   0xd   : > { %v408_v0 = vld [vmem:[%s622_s1] sm:$0xff] (!%p115_p9)   ;;  %v478_v1 = vmov (!%p115_p9), 0.0   ;;  %vm184_vm0 = vcmask (!%p115_p9), 261120   ;;  %v409_v3 = vld [vmem:[%s622_s1 + $0x8] sm:$0xff] (!%p115_p9)   ;;  %vm479_vm1 = vmmov (!%p115_p9), 0   ;;  %v410_v5 = vld [vmem:[%s622_s1 + $0x10] sm:$0xff] (!%p115_p9)   ;;  %v246_v15 = vlaneseq (!%p115_p9) }
   0xe   : > { %118 = sbr.rel (%p115_p9) target bundleno = 293 (0x125), region = 28  ;;  %351 = vmatprep.subr.bf16.mxu0 (!%p115_p9), %v478_v1  ;;  %v189_v2 = vsel (!%p115_p9), %vm184_vm0, %v408_v0, 0  ;;  %363 = vmatprep.mubr.msk.bf16.mxu0 (!%p115_p9), %vm479_vm1, %v478_v1  ;;  %v192_v4 = vsel (!%p115_p9), %vm184_vm0, %v409_v3, 0  ;;  %v195_v6 = vsel (!%p115_p9), %vm184_vm0, %v410_v5, 0  ;;  %v411_v7 = vld [vmem:[%s622_s1 + $0x18] sm:$0xff] (!%p115_p9)   ;;  %v412_v9 = vld [vmem:[%s622_s1 + $0x20] sm:$0xff] (!%p115_p9)  }
   0xf   : > { %352 = vmatpush3.bf16.xpose.msra.mxu0 (!%p115_p9), %v189_v2  ;;  %v198_v8 = vsel (!%p115_p9), %vm184_vm0, %v411_v7, 0  ;;  %p135_p10 = scmp.lt.s32.totalorder (!%p115_p9), %s517_s13, 1  ;;  %v201_v10 = vsel (!%p115_p9), %vm184_vm0, %v412_v9, 0  ;;  %v413_v11 = vld [vmem:[%s622_s1 + $0x28] sm:$0xff] (!%p115_p9)   ;;  %s132_s16 = sand.u32 (!%p115_p9), 1, %s468_s10   ;;  %v247_v16 = vand.u32 (!%p115_p9), 127, %v246_v15 }
  0x10   : > { %353 = vmatprep.subr.bf16.mxu0 (!%p115_p9), %v478_v1  ;;  %v204_v12 = vsel (!%p115_p9), %vm184_vm0, %v413_v11, 0  ;;  %s331_s17 = sshll.u32 (!%p115_p9), %s132_s16, 2  ;;  %s341_s21 = sshll.u32 (!%p115_p9), %s517_s13, 6  ;;  %vm252_vm3 = vcmask (!%p115_p9), 781312  }
  0x11   : > { %vm248_vm2 = vcmp.lt.s32.totalorder (!%p115_p9), %v247_v16, 32  ;;  %s134_s22 = scalar_lea.vmem (!%p115_p9), [#allocation2], %s331_s17  ;;  %s579_s26 = scalar_lea.hbm (!%p115_p9), %s623_s2, %s341_s21 }
  0x12   : > { %s268_s23 = sshll.u32 (!%p115_p9), %s134_s22, 4  ;;  %s255_s27 = scalar_lea.sflag (!%p115_p9), [#allocation3], %s132_s16  ;;  %s581_s23 = int_to_ptr.vmem [resolvable:$true] %s268_s23 }
  0x13   : > { %s480_s28 = smov (!%p115_p9), [#allocation2]  }
  0x14   : > { %s418_s29 = sshll.u32 (!%p115_p9), %s480_s28, 4  ;;  %s419_s29 = int_to_ptr.vmem [resolvable:$false] %s418_s29 }
  0x15   : > { %s136_s3 = scalar_select %p135_p10, %s517_s13, 1 }
  0x16   : > { %s414_s13 = scalar_lea.vmem %s581_s23, 64  ;;  %s420_s30 = scalar_lea.vmem %s419_s29, 128 }
  0x17   : > { %354 = vmatpush3.bf16.xpose.msra.mxu0 %v192_v4  ;;  %s332_s6 = sshll.u32 %s136_s3, 3  ;;  %p415_p11 = scmp.ne.s32.totalorder %s581_s23, %s414_s13 }
  0x18   : > { %355 = vmatprep.subr.bf16.mxu0 %v478_v1  ;;  %s138_s14 = scalar_lea.vmem %s621_s0, %s332_s6  ;;  %p421_p0 = scmp.lt.s32.totalorder %s581_s23, %s419_s29 }
  0x19   : > { %v140_v13 = vld [vmem:[%s138_s14] sm:$0xff]  ;;  %p416_p12 = pnand %p415_p11, %p534_p5  ;;  %p422_p1 = scmp.lt.s32.totalorder %s420_s30, %s414_s13 }
  0x1a   : > { %v141_v14 = vpack.c.bf16 %v140_v13, %v140_v13 }
  0x1b   : > { %p417_p13 = pneg %p416_p12  ;;  %p423_p2 = por %p422_p1, %p421_p0 }
  0x1d   : > { %p424_p3 = pnand %p423_p2, %p417_p13 }
  0x1f   : > { %356 = vmatpush3.bf16.xpose.msra.mxu0 %v195_v6 }
  0x20   : > { %357 = vmatprep.subr.bf16.mxu0 %v478_v1 }
  0x27   : > { %358 = vmatpush3.bf16.xpose.msra.mxu0 %v198_v8 }
  0x28   : > { %359 = vmatprep.subr.bf16.mxu0 %v478_v1 }
  0x2f   : > { %360 = vmatpush3.bf16.xpose.msra.mxu0 %v201_v10 }
  0x30   : > { %361 = vmatprep.subr.bf16.mxu0 %v478_v1 }
  0x37   : > { %362 = vmatpush3.bf16.xpose.msra.mxu0 %v204_v12 }
  0x3e   : > { %364 = vmatmul.mubr.msk.bf16.vlgmr.msra.gmra.mrb[0].mxu0 %vm184_vm0, %v141_v14 }
 0x111   : > { %v240_v17 = vpop.f32.mrb[0].mxu0 }
 0x112   : > { %v249_v18 = vmul.f32 0.35355338, %v240_v17  ;;  %v365_v19 = vpop.f32.mrb[1].mxu0 }
 0x113   : > { %v243_v20 = vpop.f32.mrb[2].mxu0 }
 0x114   : > { %v250_v21 = vsel %vm248_vm2, %v249_v18, %v240_v17  ;;  %v366_v22 = vpop.f32.mrb[3].mxu0 }
 0x115   : > { %v251_v23 = vpack.c.bf16 %v250_v21, %v250_v21 }
 0x117   : > { %253 = vst.msk [vmem:[%s134_s22] sm:$0xf] %vm252_vm3, %v251_v23 }
 0x118   : > { %427 = shalt.err (!%p424_p3)
}
 0x119   : > { %s428_s3 = scalar_lea.hbm %s579_s26, 64  ;;  %s432_s6 = scalar_lea.hbm %s623_s2, 128 }
 0x11a   : > { %p429_p4 = scmp.ne.s32.totalorder %s579_s26, %s428_s3  ;;  %p433_p9 = scmp.lt.u32.totalorder %s579_s26, %s623_s2 }
 0x11b   : > { %p434_p10 = scmp.lt.u32.totalorder %s432_s6, %s428_s3  ;;  %p436_p12 = scmp.lt.u32.totalorder %s428_s3, %s579_s26 }
 0x11c   : > { %p430_p7 = pnand %p429_p4, %p534_p5 }
 0x11d   : > { %p435_p11 = por %p434_p10, %p433_p9 }
 0x11e   : > { %p431_p8 = pneg %p430_p7 }
 0x11f   : > { %p437_p13 = por %p436_p12, %p435_p11 }
 0x121   : > { %p438_p0 = pnand %p437_p13, %p431_p8 }
 0x123   : > { %441 = shalt.err (!%p438_p0)
}
 0x124   : > { %367 = dma.vmem_to_hbm [thread:$0]  (%p534_p5), %s581_s23, 64, %s579_s26, %s255_s27  }
 0x125 PF: > { %p373_p1 = scmp.ge.s32.totalorder %s476_s12, 2  ;;  %s280_s14 = sand.u32 1, %s464_s9  }
 0x126   : > { %s281_s16 = scalar_lea.sflag [#allocation3], %s280_s14 }
 0x127   : > { %p370_p2 = pnand %p373_p1, %p538_p6 }
 0x129   : > { %459 = dma.done.wait (!%p370_p2), %s281_s16, 64  }
 0x12a   : > { %461 = vsyncadd (!%p370_p2), %s281_s16, 4294967232  ;;  %p12_p3 = scmp.ge.s32.totalorder %s521_s15, 4   ;;  %s626_s9 = smov %s468_s10 }
 0x12b   : > { %s627_s10 = smov %s472_s11  ;;  %s628_s11 = smov %s532_s18 }
 0x12c   : > { %s629_s12 = smov %s521_s15  ;;  %14 = sbr.rel (!%p12_p3) target bundleno = 3 (0x3), region = 63 }
 0x133   :  { %286 = vsyncpa [#allocation3], 1 }
 0x134   :  { %288 = vsyncpa [#allocation3 + $0x1], 1 }

</bundles_post_ra>
